<compile_context>
chip_gen: v5e
topology: v5e:2x2
jax: 0.10.0
libtpu: 0.0.40
codegen_flags: <defaults>
</compile_context>

<pallas_src>
import functools

import jax
import jax.numpy as jnp
from jax.experimental import pallas as pl
from jax.experimental.pallas import tpu as pltpu


# --------------------------------------------------------------------------- kernels
def _ffn_kernel(x_ref, w1_ref, b1_ref, w2_ref, b2_ref, o_ref, acc_ref):
    # x_ref  : (TM, E)  input tile in its native dtype (block constant across F axis)
    # w1_ref : (E, TF)  bf16 fc1 weight chunk (pre-transposed so x @ w1 == x @ W1.T)
    # b1_ref : (1, TF)  f32 fc1 bias chunk
    # w2_ref : (TF, E)  bf16 fc2 weight chunk (pre-transposed)
    # b2_ref : (1, E)   f32 fc2 bias
    # o_ref  : (TM, E)  output tile (written on the last F step)
    # acc_ref: (TM, E)  f32 accumulator scratch, resident across the F axis
    f = pl.program_id(1)

    @pl.when(f == 0)
    def _():
        # Fold b2 into the accumulator init so the finalize is just a cast+store.
        acc_ref[...] = jnp.broadcast_to(b2_ref[...], acc_ref.shape).astype(jnp.float32)

    # fc1 chunk (MXU, bf16 inputs, f32 accumulate) + bias + ReLU on the (TM, TF) chunk.
    x = x_ref[...].astype(jnp.bfloat16)
    h = jnp.dot(x, w1_ref[...], preferred_element_type=jnp.float32)
    h = jnp.maximum(h + b1_ref[...], 0.0)
    # relu_dropout -> identity (eval mode).

    # fc2 partial product for this F chunk, accumulated in f32.
    acc_ref[...] += jnp.dot(h.astype(w2_ref.dtype), w2_ref[...],
                            preferred_element_type=jnp.float32)

    @pl.when(f == pl.num_programs(1) - 1)
    def _():
        # final dropout -> identity (eval mode).
        o_ref[...] = acc_ref[...].astype(o_ref.dtype)


def _ffn_kernel_single(x_ref, w1_ref, b1_ref, w2_ref, b2_ref, o_ref):
    # Single hidden-dim chunk: no accumulator scratch, no phase gating.
    x = x_ref[...].astype(jnp.bfloat16)
    h = jnp.dot(x, w1_ref[...], preferred_element_type=jnp.float32)
    h = jnp.maximum(h + b1_ref[...], 0.0)
    y = jnp.dot(h.astype(w2_ref.dtype), w2_ref[...], preferred_element_type=jnp.float32)
    o_ref[...] = (y + b2_ref[...]).astype(o_ref.dtype)


# ------------------------------------------------------------------- tile selection
@functools.lru_cache(maxsize=1)
def _chip_params():
    """(target_tm, min_tf, tile_budget_bytes, vmem_limit_cap_bytes) for the local TPU."""
    kind = ""
    try:
        kind = jax.devices()[0].device_kind.lower()
    except Exception:
        pass
    is_v7 = ("v7" in kind) or ("tpu7" in kind)
    is_v5e = ("v5e" in kind) or ("v5 lite" in kind) or ("v5lite" in kind)
    try:
        vmem_cap = int(pltpu.get_tpu_info().vmem_capacity_bytes)
    except Exception:
        vmem_cap = (64 << 20) if is_v7 else (128 << 20)
    if not is_v7 and vmem_cap <= (64 << 20):
        is_v7 = True  # 64 MiB VMEM per core => treat like v7x for budgeting

    if is_v5e:
        # ~197 TF/s / ~0.82 TB/s ~= 246 FLOP/byte; 128-wide MXU -> tf can be 128.
        target_tm, min_tf = 256, 128
    elif is_v7:
        # ~996 TF/s/TC / ~3.2 TB/s ~= 310 FLOP/byte; 256-wide MXU; only 64 MiB VMEM.
        target_tm, min_tf = 512, 256
    else:
        # v6e default: ~918 TF/s / ~1.6 TB/s ~= 570 FLOP/byte; 256-wide MXU.
        target_tm, min_tf = 640, 256

    vmem_limit_cap = min(vmem_cap - (8 << 20), int(vmem_cap * 0.9))
    tile_budget = vmem_limit_cap - (4 << 20)
    return target_tm, min_tf, tile_budget, vmem_limit_cap


def _footprint_bytes(tm, tf, E, x_bytes, out_bytes):
    """Per-step VMEM footprint with default double buffering."""
    return (2 * tm * E * x_bytes        # x tile (native dtype, 2 buffers)
            + 4 * E * tf * 2            # w1 + w2 chunks (bf16, 2 buffers each)
            + 2 * (tf + E) * 4          # bias chunks (f32, 2 buffers)
            + 2 * tm * E * out_bytes    # output tile (2 buffers)
            + tm * E * 4                # f32 accumulator scratch
            + tm * tf * 6)              # transient fc1 activation (f32 + bf16 copy)


def _select_tiles(E, F, x_bytes, out_bytes, target_tm, min_tf, budget):
    """Largest tm (roofline), then largest lane-aligned tf dividing F, that fit VMEM."""
    tf_cands = [c for c in (2048, 1024, 512, 256, 128)
                if c >= min_tf and c <= F and F % c == 0]
    if not tf_cands:
        tf_cands = [F]  # hidden dim has no lane-aligned divisor: keep it whole
    tm_cands = sorted({t for t in (1024, 896, 768, 640, 512, 384, 256, 128)
                       if t <= target_tm}, reverse=True) or [target_tm]
    for tm in tm_cands:
        for tf in tf_cands:
            if _footprint_bytes(tm, tf, E, x_bytes, out_bytes) <= budget:
                return tm, tf
    return tm_cands[-1], tf_cands[-1]  # last resort (vmem_limit bumped accordingly)


# ------------------------------------------------------------------------- wrapper
@functools.partial(jax.jit, static_argnames=("hidden_tile",))
def feed_forward(x, w1_t, b1, w2_t, b2, *, hidden_tile=None):
    """x: (B, S, E) -> (B, S, E).  w1_t: (E, F), w2_t: (F, E) (ideally already bf16).

    Eval-mode dropout (identity).  `hidden_tile` is a test/tuning override for the
    hidden-dim tile; if given it must divide F and be 128-aligned (or equal F).
    """
    B, S, E = x.shape
    F = w1_t.shape[1]
    rows = B * S
    out_dtype = x.dtype

    target_tm, min_tf, tile_budget, vmem_cap_limit = _chip_params()
    x_bytes = jnp.dtype(x.dtype).itemsize
    out_bytes = jnp.dtype(out_dtype).itemsize

    tm, tf = _select_tiles(E, F, x_bytes, out_bytes, target_tm, min_tf, tile_budget)
    if hidden_tile is not None and F % hidden_tile == 0:
        tf = int(hidden_tile)
    if rows <= tm:
        tm = rows                       # small problem: one (full-dim) row tile
    n_row = pl.cdiv(rows, tm)           # ragged last block is OOB-masked (no jnp.pad)
    n_f = F // tf

    # Operands: weights expected bf16 (no-op if caller already converted once outside
    # the jitted path); biases f32; x stays in its native dtype and is cast in-kernel.
    w1b = w1_t if w1_t.dtype == jnp.bfloat16 else w1_t.astype(jnp.bfloat16)
    w2b = w2_t if w2_t.dtype == jnp.bfloat16 else w2_t.astype(jnp.bfloat16)
    b1_2d = b1.reshape(1, F).astype(jnp.float32)
    b2_2d = b2.reshape(1, E).astype(jnp.float32)
    x2d = x.reshape(rows, E)

    fp = _footprint_bytes(tm, tf, E, x_bytes, out_bytes)
    vmem_limit = int(min(max(fp * 1.3 + (4 << 20), 32 << 20), vmem_cap_limit))
    vmem_limit = int(max(vmem_limit, fp + (2 << 20)))

    cost = pl.CostEstimate(
        flops=4 * rows * E * F,                         # two matmuls: 2*rows*E*F each
        transcendentals=0,
        bytes_accessed=(rows * E * (x_bytes + out_bytes)   # x in + out
                        + n_row * 2 * E * F * 2            # W1+W2 re-streamed per row tile
                        + n_row * (F + E) * 4),            # biases
    )
    compiler_params_2d = pltpu.CompilerParams(
        dimension_semantics=("parallel", "arbitrary"),
        vmem_limit_bytes=vmem_limit,
    )
    compiler_params_1d = pltpu.CompilerParams(
        dimension_semantics=("parallel",),
        vmem_limit_bytes=vmem_limit,
    )

    if n_f == 1:
        # Whole hidden dim resident: scratch-free, single-phase kernel; weights are
        # DMA'd once (block index constant across row tiles).
        out2d = pl.pallas_call(
            _ffn_kernel_single,
            out_shape=jax.ShapeDtypeStruct((rows, E), out_dtype),
            grid_spec=pltpu.PrefetchScalarGridSpec(
                num_scalar_prefetch=0,
                grid=(n_row,),
                in_specs=[
                    pl.BlockSpec((tm, E), lambda i: (i, 0)),   # x tile
                    pl.BlockSpec((E, F), lambda i: (0, 0)),    # W1^T (resident)
                    pl.BlockSpec((1, F), lambda i: (0, 0)),    # b1
                    pl.BlockSpec((F, E), lambda i: (0, 0)),    # W2^T (resident)
                    pl.BlockSpec((1, E), lambda i: (0, 0)),    # b2
                ],
                out_specs=pl.BlockSpec((tm, E), lambda i: (i, 0)),
            ),
            compiler_params=compiler_params_1d,
            cost_estimate=cost,
        )(x2d, w1b, b1_2d, w2b, b2_2d)
    else:
        out2d = pl.pallas_call(
            _ffn_kernel,
            out_shape=jax.ShapeDtypeStruct((rows, E), out_dtype),
            grid_spec=pltpu.PrefetchScalarGridSpec(
                num_scalar_prefetch=0,
                grid=(n_row, n_f),
                in_specs=[
                    pl.BlockSpec((tm, E), lambda i, f: (i, 0)),   # x tile (constant over f)
                    pl.BlockSpec((E, tf), lambda i, f: (0, f)),   # W1^T chunk (streamed)
                    pl.BlockSpec((1, tf), lambda i, f: (0, f)),   # b1 chunk
                    pl.BlockSpec((tf, E), lambda i, f: (f, 0)),   # W2^T chunk (streamed)
                    pl.BlockSpec((1, E), lambda i, f: (0, 0)),    # b2 (resident)
                ],
                out_specs=pl.BlockSpec((tm, E), lambda i, f: (i, 0)),
                scratch_shapes=[pltpu.VMEM((tm, E), jnp.float32)],
            ),
            compiler_params=compiler_params_2d,
            cost_estimate=cost,
        )(x2d, w1b, b1_2d, w2b, b2_2d)

    return out2d.reshape(B, S, E)


# --------------------------------------------------------------------------- helpers
def init_params(key, embed_dim, ffn_embed_dim, dtype=jnp.float32):
    """Deterministic parameter init (PyTorch-Linear-like uniform bounds)."""
    k1, k2, k3, k4 = jax.random.split(key, 4)
    bound1 = 1.0 / (embed_dim ** 0.5)
    bound2 = 1.0 / (ffn_embed_dim ** 0.5)
    # torch stores fc1.weight as (F, E); we keep the transposed (E, F) layout for x @ W^T.
    w1_t = jax.random.uniform(k1, (embed_dim, ffn_embed_dim), dtype, -bound1, bound1)
    b1 = jax.random.uniform(k2, (ffn_embed_dim,), dtype, -bound1, bound1)
    w2_t = jax.random.uniform(k3, (ffn_embed_dim, embed_dim), dtype, -bound2, bound2)
    b2 = jax.random.uniform(k4, (embed_dim,), dtype, -bound2, bound2)
    return w1_t, b1, w2_t, b2


def _ref_bf16(x, w1_b, b1, w2_b, b2):
    """Reference mirroring the kernel's precision (bf16 matmul inputs, f32 accumulate)."""
    hi = jax.lax.Precision.HIGHEST
    f32 = jnp.float32
    xb = x.astype(jnp.bfloat16).astype(f32)
    h = jnp.maximum(jnp.dot(xb, w1_b.astype(f32), precision=hi) + b1, 0.0)
    return jnp.dot(h.astype(jnp.bfloat16).astype(f32), w2_b.astype(f32), precision=hi) + b2


def _ref_f32(x, w1_t, b1, w2_t, b2):
    hi = jax.lax.Precision.HIGHEST
    h = jnp.maximum(jnp.dot(x, w1_t, precision=hi) + b1, 0.0)
    return jnp.dot(h, w2_t, precision=hi) + b2


if __name__ == "__main__":
    key = jax.random.PRNGKey(0)

    # ---- test 1: module-sized small shapes, single-chunk path ----
    batch, seq, embed_dim, ffn_embed_dim = 2, 8, 32, 64
    kx, kp = jax.random.split(key)
    x = jax.random.normal(kx, (batch, seq, embed_dim), jnp.float32)
    w1_t, b1, w2_t, b2 = init_params(kp, embed_dim, ffn_embed_dim)
    # Convert weights to bf16 once, OUTSIDE the jitted call path (review item).
    w1_b = w1_t.astype(jnp.bfloat16)
    w2_b = w2_t.astype(jnp.bfloat16)

    out = jax.block_until_ready(feed_forward(x, w1_b, b1, w2_b, b2))
    assert out.shape == (batch, seq, embed_dim)
    ref = _ref_bf16(x, w1_b, b1, w2_b, b2)
    assert jnp.allclose(out, ref, atol=2e-3, rtol=2e-3), float(jnp.max(jnp.abs(out - ref)))
    # Sanity vs. full-f32 math (loose tolerance from intentional bf16 quantization).
    assert jnp.allclose(out, _ref_f32(x, w1_t, b1, w2_t, b2), atol=5e-2, rtol=5e-2)

    # ---- test 2: exercise the multi-chunk (F-axis reduction, f32 accumulator) path ----
    e2, f2 = 128, 256
    kx2, kp2 = jax.random.split(kp)
    x2 = jax.random.normal(kx2, (batch, seq, e2), jnp.float32)
    w1_t2, b1_2, w2_t2, b2_2 = init_params(kp2, e2, f2)
    w1_b2 = w1_t2.astype(jnp.bfloat16)
    w2_b2 = w2_t2.astype(jnp.bfloat16)

    out2 = jax.block_until_ready(
        feed_forward(x2, w1_b2, b1_2, w2_b2, b2_2, hidden_tile=128))
    ref2 = _ref_bf16(x2, w1_b2, b1_2, w2_b2, b2_2)
    assert out2.shape == (batch, seq, e2)
    assert jnp.allclose(out2, ref2, atol=2e-3, rtol=2e-3), float(jnp.max(jnp.abs(out2 - ref2)))

    print("KERNEL_OK")
</pallas_src>

<mosaic_0001>
module attributes {stable_mosaic.version = 11 : i64} {
  func.func @_ffn_kernel_single(%arg0: i32, %arg1: memref<16x32xf32, #tpu.memory_space<vmem>>, %arg2: memref<32x64xbf16, #tpu.memory_space<vmem>>, %arg3: memref<1x64xf32, #tpu.memory_space<vmem>>, %arg4: memref<64x32xbf16, #tpu.memory_space<vmem>>, %arg5: memref<1x32xf32, #tpu.memory_space<vmem>>, %arg6: memref<16x32xf32, #tpu.memory_space<vmem>>) attributes {dimension_semantics = [#tpu.dimension_semantics<parallel>], iteration_bounds = array<i64: 1>, scalar_prefetch = 0 : i64, scratch_operands = 0 : i64, tpu.core_type = #tpu.core_type<tc>, window_params = [{transform_indices = @transform_0, window_bounds = array<i64: 16, 32>}, {pipeline_mode = #tpu.pipeline_mode<synchronous>, transform_indices = @transform_1, window_bounds = array<i64: 32, 64>}, {pipeline_mode = #tpu.pipeline_mode<synchronous>, transform_indices = @transform_2, window_bounds = array<i64: 1, 64>}, {pipeline_mode = #tpu.pipeline_mode<synchronous>, transform_indices = @transform_3, window_bounds = array<i64: 64, 32>}, {pipeline_mode = #tpu.pipeline_mode<synchronous>, transform_indices = @transform_4, window_bounds = array<i64: 1, 32>}, {transform_indices = @transform_5, window_bounds = array<i64: 16, 32>}]} {
    %c0 = arith.constant 0 : index
    %c0_0 = arith.constant 0 : index
    %0 = vector.load %arg1[%c0, %c0_0] : memref<16x32xf32, #tpu.memory_space<vmem>>, vector<16x32xf32>
    %1 = arith.truncf %0 : vector<16x32xf32> to vector<16x32xbf16>
    %c0_1 = arith.constant 0 : index
    %c0_2 = arith.constant 0 : index
    %2 = vector.load %arg2[%c0_1, %c0_2] : memref<32x64xbf16, #tpu.memory_space<vmem>>, vector<32x64xbf16>
    %cst = arith.constant dense<0.000000e+00> : vector<16x64xf32>
    %3 = tpu.matmul %1, %2, %cst {dimension_numbers = #tpu.dot_dimension_numbers<[1], [0], [0], [1], [0, 0, 1, 1], [], []>} : vector<16x32xbf16>, vector<32x64xbf16>, vector<16x64xf32> -> vector<16x64xf32>
    %c0_3 = arith.constant 0 : index
    %c0_4 = arith.constant 0 : index
    %4 = vector.load %arg3[%c0_3, %c0_4] : memref<1x64xf32, #tpu.memory_space<vmem>>, vector<1x64xf32>
    %5 = vector.broadcast %4 : vector<1x64xf32> to vector<16x64xf32>
    %6 = arith.addf %3, %5 : vector<16x64xf32>
    %cst_5 = arith.constant 0.000000e+00 : f32
    %7 = vector.broadcast %cst_5 : f32 to vector<16x64xf32>
    %8 = arith.maximumf %6, %7 : vector<16x64xf32>
    %9 = arith.truncf %8 : vector<16x64xf32> to vector<16x64xbf16>
    %c0_6 = arith.constant 0 : index
    %c0_7 = arith.constant 0 : index
    %10 = vector.load %arg4[%c0_6, %c0_7] : memref<64x32xbf16, #tpu.memory_space<vmem>>, vector<64x32xbf16>
    %cst_8 = arith.constant dense<0.000000e+00> : vector<16x32xf32>
    %11 = tpu.matmul %9, %10, %cst_8 {dimension_numbers = #tpu.dot_dimension_numbers<[1], [0], [0], [1], [0, 0, 1, 1], [], []>} : vector<16x64xbf16>, vector<64x32xbf16>, vector<16x32xf32> -> vector<16x32xf32>
    %c0_9 = arith.constant 0 : index
    %c0_10 = arith.constant 0 : index
    %12 = vector.load %arg5[%c0_9, %c0_10] : memref<1x32xf32, #tpu.memory_space<vmem>>, vector<1x32xf32>
    %13 = vector.broadcast %12 : vector<1x32xf32> to vector<16x32xf32>
    %14 = arith.addf %11, %13 : vector<16x32xf32>
    %c0_11 = arith.constant 0 : index
    %c0_12 = arith.constant 0 : index
    %15 = vector.load %arg6[%c0_11, %c0_12] : memref<16x32xf32, #tpu.memory_space<vmem>>, vector<16x32xf32>
    tpu.vector_store %arg6[%c0_11, %c0_12], %14 {strides = array<i32>} : memref<16x32xf32, #tpu.memory_space<vmem>>, vector<16x32xf32>,
    return
  }
  func.func @transform_0(%arg0: i32) -> (i32, i32) {
    %c0_i32 = arith.constant 0 : i32
    %c0_i32_0 = arith.constant 0 : i32
    return %arg0, %c0_i32 : i32, i32
  }
  func.func @transform_1(%arg0: i32) -> (i32, i32) {
    %c0_i32 = arith.constant 0 : i32
    %c0_i32_0 = arith.constant 0 : i32
    %c0_i32_1 = arith.constant 0 : i32
    return %c0_i32, %c0_i32_0 : i32, i32
  }
  func.func @transform_2(%arg0: i32) -> (i32, i32) {
    %c0_i32 = arith.constant 0 : i32
    %c0_i32_0 = arith.constant 0 : i32
    %c0_i32_1 = arith.constant 0 : i32
    return %c0_i32, %c0_i32_0 : i32, i32
  }
  func.func @transform_3(%arg0: i32) -> (i32, i32) {
    %c0_i32 = arith.constant 0 : i32
    %c0_i32_0 = arith.constant 0 : i32
    %c0_i32_1 = arith.constant 0 : i32
    return %c0_i32, %c0_i32_0 : i32, i32
  }
  func.func @transform_4(%arg0: i32) -> (i32, i32) {
    %c0_i32 = arith.constant 0 : i32
    %c0_i32_0 = arith.constant 0 : i32
    %c0_i32_1 = arith.constant 0 : i32
    return %c0_i32, %c0_i32_0 : i32, i32
  }
  func.func @transform_5(%arg0: i32) -> (i32, i32) {
    %c0_i32 = arith.constant 0 : i32
    %c0_i32_0 = arith.constant 0 : i32
    return %arg0, %c0_i32 : i32, i32
  }
}

</mosaic_0001>

<bundles_post_ra>
// kernel: feed_forward.1
= control target key start
LH: loop header
LB: loop body
LE: loop exit
PB: predicated region body
PF: predicated region fallthrough
CT: control target
= control target key end

     0   :  { %s272_s0 = inlined_call_operand.vmem [shape: f32[16,32], index: 0, kind: input, shape index: {}]   ;;  %s273_s1 = inlined_call_operand.vmem [shape: bf16[32,64], index: 1, kind: input, shape index: {}]   ;;  %s274_s2 = inlined_call_operand.vmem [shape: f32[1,64], index: 2, kind: input, shape index: {}]   ;;  %s275_s3 = inlined_call_operand.vmem [shape: bf16[64,32], index: 3, kind: input, shape index: {}]   ;;  %s276_s4 = inlined_call_operand.vmem [shape: f32[1,32], index: 4, kind: input, shape index: {}]   ;;  %s277_s5 = inlined_call_operand.hbm [shape: f32[16,32], index: 5, kind: output, shape index: {}]  }
   0x1   :  { %v167_v0 = vld [vmem:[%s273_s1 + $0x8] sm:$0xff]  ;;  %v166_v1 = vld [vmem:[%s273_s1] sm:$0xff] }
   0x2   :  { %v22_v2 = vld [vmem:[%s272_s0] sm:$0xff]  ;;  %55 = vmatpush.bf16.msra.mxu0 %v167_v0  ;;  %v23_v3 = vld [vmem:[%s272_s0 + $0x8] sm:$0xff] }
   0x3   :  { %10 = vsyncpa [#allocation3], 0  ;;  %v24_v4 = vpack.c.bf16 %v23_v3, %v22_v2  ;;  %vm45_vm0 = vcmask 261120   ;;  %v171_v5 = vld [vmem:[%s275_s3 + $0x18] sm:$0xff]  ;;  %v170_v6 = vld [vmem:[%s275_s3 + $0x10] sm:$0xff]  ;;  %vm102_vm1 = vcmask 523264  }
   0x4   :  { %110 = vmatpush.bf16.msra.mxu1 %v171_v5  ;;  %v169_v7 = vld [vmem:[%s275_s3 + $0x8] sm:$0xff]  ;;  %v168_v8 = vld [vmem:[%s275_s3] sm:$0xff]  ;;  %s203_s3 = smov [#allocation2]   ;;  %s128_s13 = sshll.u32 %s277_s5, 4  ;;  %s129_s13 = int_to_ptr.hbm [resolvable:$true] %s128_s13 }
   0x5   :  { %v175_v10 = vld [vmem:[%s274_s2] ss:$0 sm:$0xff]  ;;  %s126_s11 = sshll.u32 %s203_s3, 4  ;;  %s204_s14 = smov 128   ;;  %s127_s11 = int_to_ptr.vmem [resolvable:$true] %s126_s11 }
   0x6   :  { %56 = vmatpush.bf16.msra.mxu0 %v166_v1  ;;  %v176_v17 = vld [vmem:[%s276_s4] ss:$0 sm:$0xff]  ;;  %s205_s15 = smov 8  }
   0x8   :  { %111 = vmatpush.bf16.msra.mxu1 %v170_v6 }
   0x9   :  { %148 = vmatmul.msk.bf16.vlgmr.msra.gmra.mxu0 %vm45_vm0, %v24_v4 }
   0xc   :  { %112 = vmatpush.bf16.msra.mxu1 %v169_v7 }
  0x10   :  { %113 = vmatpush.bf16.msra.mxu1 %v168_v8 }
  0x86   :  { %v58_v9 = vpop.f32.mrf.mxu0 }
  0x87   :  { %v59_v11 = vadd.f32 %v175_v10, %v58_v9 }
  0x89   :  { %v63_v14 = vmax.f32 %v59_v11, 0.0 }
  0x8e   :  { %v60_v12 = vpop.f32.mrf.mxu0 }
  0x8f   :  { %v61_v13 = vadd.f32 %v175_v10, %v60_v12 }
  0x91   :  { %v64_v15 = vmax.f32 %v61_v13, 0.0 }
  0x93   :  { %v65_v16 = vpack.c.bf16 %v64_v15, %v63_v14 }
  0x95   :  { %165 = vmatmul.msk.bf16.vlgmr.msra.gmra.mxu1 %vm102_vm1, %v65_v16 }
 0x112   :  { %v115_v18 = vpop.f32.mrf.mxu1 }
 0x113   :  { %v116_v19 = vadd.f32 %v176_v17, %v115_v18 }
 0x115   :  { %120 = vst.msk [vmem:[#allocation2] sm:$0xff] %vm45_vm0, %v116_v19 }
 0x11a   :  { %v117_v20 = vpop.f32.mrf.mxu1 }
 0x11b   :  { %v118_v21 = vadd.f32 %v176_v17, %v117_v20 }
 0x11d   :  { %121 = vst.msk [vmem:[#allocation2 + $0x8] sm:$0xff] %vm45_vm0, %v118_v21 }
 0x11e   :  { %134 = dma.vmem_to_hbm [thread:$0]  %s127_s11, 256, %s129_s13, [#allocation3], %s204_s14, %s204_s14, %s205_s15  }
 0x11f   :  { %201 = dma.done.wait [#allocation3], 256  }
 0x120   :  { %202 = vsyncadd [#allocation3], 4294967040 }
 0x121   :  { %139 = vsyncpa [#allocation3], 1 }

</bundles_post_ra>
